<compile_context>
chip_gen: v6e
topology: v6e:2x2x1
jax: 0.10.0
libtpu: 0.0.40
codegen_flags: <defaults>
</compile_context>

<pallas_src>
import functools

import jax
import jax.numpy as jnp
from jax.experimental import pallas as pl
from jax.experimental.pallas import tpu as pltpu


def _round_up(v, m):
    return (v + m - 1) // m * m


def _choose_n_tile(batch, k_total, c_pad, num_heads):
    """Pick a batch tile so double-buffered activations + f32 logits fit comfortably inside the
    default scoped-VMEM window on every generation (v7x has half the VMEM of v5e/v6e)."""
    budget = 8 << 20  # conservative slice of the smallest (v7x) scoped-VMEM window
    per_row = 2 * 4 * (k_total + 1) + 4 * num_heads * c_pad + 64
    cap = max(8, (budget // per_row) // 8 * 8)
    return int(min(_round_up(batch, 8), cap, 1024))


def _mobile_neck_loss_kernel(*refs, num_heads, out_channels, batch, loss_weight):
    """Fused multi-head Linear + softmax cross-entropy, tiled over the batch.

    refs layout (inputs, outputs, scratch):
      refs[0]                 : (NT, 1)      i32  VMEM  target class indices for this tile
      refs[1 + 3h + 0]        : (NT, K_h)    f32  VMEM  head-h activations (K unpadded)
      refs[1 + 3h + 1]        : (K_h, C_pad) bf16 VMEM  head-h weight, classes padded to 128
      refs[1 + 3h + 2]        : (1,  C_pad)  f32  VMEM  head-h bias
      refs[1 + 3H]            : (1, 1)       f32  VMEM  out: loss_weight * sum_h mean_n CE
      refs[2 + 3H], refs[3+3H]: (1, 1)       f32  VMEM  scratch: loss sum / valid-sample count
    """
    tgt_ref = refs[0]
    head_refs = refs[1:1 + 3 * num_heads]
    loss_ref = refs[1 + 3 * num_heads]
    loss_acc = refs[2 + 3 * num_heads]
    cnt_acc = refs[3 + 3 * num_heads]

    step = pl.program_id(0)

    @pl.when(step == 0)
    def _init():
        loss_acc[...] = jnp.zeros_like(loss_acc)
        cnt_acc[...] = jnp.zeros_like(cnt_acc)

    tgt = tgt_ref[...]                                   # (NT, 1) i32
    nt = tgt.shape[0]
    c_pad = head_refs[1].shape[1]

    # Row validity: the last tile may run past the batch; targets < 0 (ignore_index) or out of
    # range are excluded from both the numerator and the mean's denominator.
    row_ids = step * nt + jax.lax.broadcasted_iota(jnp.int32, (nt, 1), 0)
    valid = (row_ids < batch) & (tgt >= 0) & (tgt < out_channels)          # (NT, 1) bool

    # One shared 2-D iota for the target gather + padded-class masking (reused by every head).
    lane = jax.lax.broadcasted_iota(jnp.int32, (nt, c_pad), 1)
    tgt_onehot = lane == tgt                                               # (NT, C_pad)
    class_valid = lane < out_channels                                      # (NT, C_pad)

    tile_loss = jnp.zeros((1, 1), jnp.float32)
    for h in range(num_heads):
        x_ref, w_ref, b_ref = head_refs[3 * h:3 * h + 3]
        # bf16 MXU matmul with f32 accumulation; everything downstream stays f32.
        logits = jnp.dot(x_ref[...].astype(jnp.bfloat16), w_ref[...],
                         preferred_element_type=jnp.float32) + b_ref[...]  # (NT, C_pad) f32
        # -1e30 sentinel is only applied to f32 logits (safe); padded class lanes never win.
        logits = jnp.where(class_valid, logits, -1e30)
        m = jnp.max(logits, axis=-1, keepdims=True)                        # (NT, 1)
        z = logits - m
        lse = jnp.log(jnp.sum(jnp.exp(z), axis=-1, keepdims=True))         # (NT, 1)
        z_t = jnp.sum(jnp.where(tgt_onehot, z, 0.0), axis=-1, keepdims=True)
        # Select (not multiply) so garbage in out-of-bounds rows can never leak NaNs.
        per_sample = jnp.where(valid, lse - z_t, 0.0)                      # (NT, 1)
        tile_loss = tile_loss + jnp.sum(per_sample, axis=0, keepdims=True)

    loss_acc[...] += tile_loss
    cnt_acc[...] += jnp.sum(valid.astype(jnp.float32), axis=0, keepdims=True)

    @pl.when(step == pl.num_programs(0) - 1)
    def _finalize():
        denom = jnp.maximum(cnt_acc[...], 1.0)
        loss_ref[...] = loss_weight * loss_acc[...] / denom


@functools.partial(jax.jit, static_argnames=("out_channels", "loss_weight", "batch", "n_tile"))
def _mobile_neck_loss(targets, xs, ws, bs, *, out_channels, loss_weight, batch, n_tile):
    num_heads = len(xs)
    c_pad = ws[0].shape[1]
    num_tiles = pl.cdiv(batch, n_tile)

    kernel = functools.partial(
        _mobile_neck_loss_kernel, num_heads=num_heads, out_channels=out_channels,
        batch=batch, loss_weight=float(loss_weight))

    in_specs = [pl.BlockSpec((n_tile, 1), lambda i: (i, 0))]      # targets, tiled over batch
    operands = [targets]
    for x, w, b in zip(xs, ws, bs):
        k = x.shape[1]
        in_specs += [
            pl.BlockSpec((n_tile, k), lambda i: (i, 0)),          # activations: tiled over batch
            pl.BlockSpec((k, c_pad), lambda i: (0, 0)),           # weight: resident across tiles
            pl.BlockSpec((1, c_pad), lambda i: (0, 0)),           # bias:   resident across tiles
        ]
        operands += [x, w, b]

    flops = sum(2 * batch * x.shape[1] * c_pad for x in xs)
    bytes_accessed = (targets.size * targets.dtype.itemsize
                      + sum(x.size * x.dtype.itemsize for x in xs)
                      + sum(w.size * w.dtype.itemsize for w in ws)
                      + sum(b.size * b.dtype.itemsize for b in bs) + 4)

    out = pl.pallas_call(
        kernel,
        grid=(num_tiles,),
        out_shape=jax.ShapeDtypeStruct((1, 1), jnp.float32),
        in_specs=in_specs,
        out_specs=pl.BlockSpec((1, 1), lambda i: (0, 0)),
        scratch_shapes=[pltpu.VMEM((1, 1), jnp.float32),     # running loss sum
                        pltpu.VMEM((1, 1), jnp.float32)],    # running valid-sample count
        compiler_params=pltpu.CompilerParams(dimension_semantics=("arbitrary",)),
        cost_estimate=pl.CostEstimate(
            flops=int(flops),
            transcendentals=int(num_heads * batch * c_pad),
            bytes_accessed=int(bytes_accessed)),
    )(*operands)
    return out[0, 0]


class MobileNeckPallas:
    """JAX/Pallas port of MobileNeck (forward only; Dropout(0.5) is eval-mode identity)."""

    def __init__(self, in_channels, out_channels, loss_weight=0.5, key=None):
        self.loss_weight = float(loss_weight)
        self.in_channels = tuple(int(c) for c in in_channels)
        self.out_channels = int(out_channels)
        self.num_heads = len(self.in_channels)
        # Classes live on the lane axis -> padded (once, at init) to a 128-multiple.
        # The contraction dim K is NOT padded (full-array blocks are exempt from (8,128)).
        self.c_pad = _round_up(self.out_channels, 128)

        key = jax.random.PRNGKey(0) if key is None else key
        self.weights = []   # unpadded f32 (C_in, C_out); used by the pure-JAX references
        self.biases = []    # unpadded f32 (C_out,)
        w_padded = []       # bf16 (C_in, C_pad); padded class columns are zero (masked in-kernel)
        b_padded = []       # f32  (1, C_pad)
        for i, c_in in enumerate(self.in_channels):
            k = jax.random.fold_in(key, i)
            # normal_init(m, std=0.01): weight ~ N(0, 0.01^2), bias = 0.
            w = 0.01 * jax.random.normal(k, (c_in, self.out_channels), dtype=jnp.float32)
            b = jnp.zeros((self.out_channels,), dtype=jnp.float32)
            self.weights.append(w)
            self.biases.append(b)
            w_pad = jnp.zeros((c_in, self.c_pad), jnp.bfloat16)
            w_pad = w_pad.at[:, :self.out_channels].set(w.astype(jnp.bfloat16))
            b_pad = jnp.zeros((1, self.c_pad), jnp.float32)
            b_pad = b_pad.at[0, :self.out_channels].set(b)
            w_padded.append(w_pad)
            b_padded.append(b_pad)
        self.w_padded = tuple(w_padded)
        self.b_padded = tuple(b_padded)

    def forward(self, x, target):
        # Match PyTorch handling: target is a batch of class indices (scalar gets a batch dim).
        target = jnp.atleast_1d(target).astype(jnp.int32)
        batch = int(x[0].shape[0])
        n_tile = _choose_n_tile(batch, sum(self.in_channels), self.c_pad, self.num_heads)
        loss_aux = _mobile_neck_loss(
            target.reshape(batch, 1), tuple(x), self.w_padded, self.b_padded,
            out_channels=self.out_channels, loss_weight=self.loss_weight,
            batch=batch, n_tile=n_tile)
        return {"loss_aux": loss_aux}


def _reference_forward_f32(neck, x, target):
    """Pure-JAX f32 reference (module-exact math)."""
    target = jnp.atleast_1d(target)
    onehot = jax.nn.one_hot(target, neck.out_channels, dtype=jnp.float32)
    loss = 0.0
    for i, x_i in enumerate(x):
        logits = x_i.astype(jnp.float32) @ neck.weights[i] + neck.biases[i]
        logp = jax.nn.log_softmax(logits, axis=-1)
        loss = loss + neck.loss_weight * jnp.mean(-jnp.sum(onehot * logp, axis=-1))
    return loss


def _reference_forward_bf16(neck, x, target):
    """Pure-JAX reference with the kernel's bf16-input / f32-accumulate matmul."""
    target = jnp.atleast_1d(target)
    onehot = jax.nn.one_hot(target, neck.out_channels, dtype=jnp.float32)
    loss = 0.0
    for i, x_i in enumerate(x):
        logits = jnp.dot(x_i.astype(jnp.bfloat16), neck.weights[i].astype(jnp.bfloat16),
                         preferred_element_type=jnp.float32) + neck.biases[i]
        logp = jax.nn.log_softmax(logits, axis=-1)
        loss = loss + neck.loss_weight * jnp.mean(-jnp.sum(onehot * logp, axis=-1))
    return loss


if __name__ == "__main__":
    key = jax.random.PRNGKey(0)
    batch = 8
    in_channels = (32, 48)
    out_channels = 16

    kx0, kx1, kt, kp = jax.random.split(key, 4)
    x = (
        jax.random.normal(kx0, (batch, in_channels[0]), dtype=jnp.float32),
        jax.random.normal(kx1, (batch, in_channels[1]), dtype=jnp.float32),
    )
    target = jax.random.randint(kt, (batch,), 0, out_channels, dtype=jnp.int32)

    neck = MobileNeckPallas(in_channels, out_channels, loss_weight=0.5, key=kp)

    losses = neck.forward(x, target)
    loss_aux = jax.block_until_ready(losses["loss_aux"])

    ref_bf16 = _reference_forward_bf16(neck, x, target)   # same matmul precision as the kernel
    ref_f32 = _reference_forward_f32(neck, x, target)     # module-exact f32 math
    assert jnp.allclose(loss_aux, ref_bf16, atol=1e-4, rtol=1e-4), (loss_aux, ref_bf16)
    assert jnp.allclose(loss_aux, ref_f32, atol=1e-2, rtol=1e-2), (loss_aux, ref_f32)

    print("KERNEL_OK")
</pallas_src>

<mosaic_0001>
module attributes {stable_mosaic.version = 11 : i64} {
  func.func @_mobile_neck_loss_kernel(%arg0: i32, %arg1: memref<8x1xi32, #tpu.memory_space<vmem>>, %arg2: memref<8x32xf32, #tpu.memory_space<vmem>>, %arg3: memref<32x128xbf16, #tpu.memory_space<vmem>>, %arg4: memref<1x128xf32, #tpu.memory_space<vmem>>, %arg5: memref<8x48xf32, #tpu.memory_space<vmem>>, %arg6: memref<48x128xbf16, #tpu.memory_space<vmem>>, %arg7: memref<1x128xf32, #tpu.memory_space<vmem>>, %arg8: memref<1x1xf32, #tpu.memory_space<vmem>>, %arg9: memref<1x1xf32, #tpu.memory_space<vmem>>, %arg10: memref<1x1xf32, #tpu.memory_space<vmem>>) attributes {dimension_semantics = [#tpu.dimension_semantics<arbitrary>], iteration_bounds = array<i64: 1>, scalar_prefetch = 0 : i64, scratch_operands = 2 : i64, tpu.core_type = #tpu.core_type<tc>, window_params = [{transform_indices = @transform_0, window_bounds = array<i64: 8, 1>}, {transform_indices = @transform_1, window_bounds = array<i64: 8, 32>}, {pipeline_mode = #tpu.pipeline_mode<synchronous>, transform_indices = @transform_2, window_bounds = array<i64: 32, 128>}, {pipeline_mode = #tpu.pipeline_mode<synchronous>, transform_indices = @transform_3, window_bounds = array<i64: 1, 128>}, {transform_indices = @transform_4, window_bounds = array<i64: 8, 48>}, {pipeline_mode = #tpu.pipeline_mode<synchronous>, transform_indices = @transform_5, window_bounds = array<i64: 48, 128>}, {pipeline_mode = #tpu.pipeline_mode<synchronous>, transform_indices = @transform_6, window_bounds = array<i64: 1, 128>}, {pipeline_mode = #tpu.pipeline_mode<synchronous>, transform_indices = @transform_7, window_bounds = array<i64: 1, 1>}]} {
    %c0_i32 = arith.constant 0 : i32
    %0 = arith.cmpi eq, %arg0, %c0_i32 : i32
    %1 = arith.extui %0 : i1 to i32
    %c0_i32_0 = arith.constant 0 : i32
    %2 = arith.cmpi ne, %1, %c0_i32_0 : i32
    scf.if %2 {
      %cst_44 = arith.constant 0.000000e+00 : f32
      %89 = vector.broadcast %cst_44 : f32 to vector<1x1xf32>
      %c0_45 = arith.constant 0 : index
      %c0_46 = arith.constant 0 : index
      %90 = vector.load %arg9[%c0_45, %c0_46] : memref<1x1xf32, #tpu.memory_space<vmem>>, vector<1x1xf32>
      tpu.vector_store %arg9[%c0_45, %c0_46], %89 {strides = array<i32>} : memref<1x1xf32, #tpu.memory_space<vmem>>, vector<1x1xf32>,
      %cst_47 = arith.constant 0.000000e+00 : f32
      %91 = vector.broadcast %cst_47 : f32 to vector<1x1xf32>
      %c0_48 = arith.constant 0 : index
      %c0_49 = arith.constant 0 : index
      %92 = vector.load %arg10[%c0_48, %c0_49] : memref<1x1xf32, #tpu.memory_space<vmem>>, vector<1x1xf32>
      tpu.vector_store %arg10[%c0_48, %c0_49], %91 {strides = array<i32>} : memref<1x1xf32, #tpu.memory_space<vmem>>, vector<1x1xf32>,
    } else {
    }
    %c0 = arith.constant 0 : index
    %c0_1 = arith.constant 0 : index
    %3 = vector.load %arg1[%c0, %c0_1] : memref<8x1xi32, #tpu.memory_space<vmem>>, vector<8x1xi32>
    %c8_i32 = arith.constant 8 : i32
    %4 = arith.muli %arg0, %c8_i32 : i32
    %5 = tpu.iota {dimensions = array<i32: 0>} : vector<8x1xi32>
    %6 = vector.broadcast %4 : i32 to vector<8x1xi32>
    %7 = arith.addi %6, %5 : vector<8x1xi32>
    %c8_i32_2 = arith.constant 8 : i32
    %8 = vector.broadcast %c8_i32_2 : i32 to vector<8x1xi32>
    %9 = arith.cmpi slt, %7, %8 : vector<8x1xi32>
    %c0_i32_3 = arith.constant 0 : i32
    %10 = vector.broadcast %c0_i32_3 : i32 to vector<8x1xi32>
    %11 = arith.cmpi sge, %3, %10 : vector<8x1xi32>
    %12 = arith.andi %9, %11 : vector<8x1xi1>
    %c16_i32 = arith.constant 16 : i32
    %13 = vector.broadcast %c16_i32 : i32 to vector<8x1xi32>
    %14 = arith.cmpi slt, %3, %13 : vector<8x1xi32>
    %15 = arith.andi %12, %14 : vector<8x1xi1>
    %16 = tpu.iota {dimensions = array<i32: 1>} : vector<8x128xi32>
    %17 = vector.broadcast %3 : vector<8x1xi32> to vector<8x128xi32>
    %18 = arith.cmpi eq, %16, %17 : vector<8x128xi32>
    %c16_i32_4 = arith.constant 16 : i32
    %19 = vector.broadcast %c16_i32_4 : i32 to vector<8x128xi32>
    %20 = arith.cmpi slt, %16, %19 : vector<8x128xi32>
    %cst = arith.constant 0.000000e+00 : f32
    %21 = vector.broadcast %cst : f32 to vector<1x1xf32>
    %c0_5 = arith.constant 0 : index
    %c0_6 = arith.constant 0 : index
    %22 = vector.load %arg2[%c0_5, %c0_6] : memref<8x32xf32, #tpu.memory_space<vmem>>, vector<8x32xf32>
    %23 = arith.truncf %22 : vector<8x32xf32> to vector<8x32xbf16>
    %c0_7 = arith.constant 0 : index
    %c0_8 = arith.constant 0 : index
    %24 = vector.load %arg3[%c0_7, %c0_8] : memref<32x128xbf16, #tpu.memory_space<vmem>>, vector<32x128xbf16>
    %cst_9 = arith.constant dense<0.000000e+00> : vector<8x128xf32>
    %25 = tpu.matmul %23, %24, %cst_9 {dimension_numbers = #tpu.dot_dimension_numbers<[1], [0], [0], [1], [0, 0, 1, 1], [], []>} : vector<8x32xbf16>, vector<32x128xbf16>, vector<8x128xf32> -> vector<8x128xf32>
    %c0_10 = arith.constant 0 : index
    %c0_11 = arith.constant 0 : index
    %26 = vector.load %arg4[%c0_10, %c0_11] : memref<1x128xf32, #tpu.memory_space<vmem>>, vector<1x128xf32>
    %27 = vector.broadcast %26 : vector<1x128xf32> to vector<8x128xf32>
    %28 = arith.addf %25, %27 : vector<8x128xf32>
    %cst_12 = arith.constant -1.000000e+30 : f32
    %29 = vector.broadcast %cst_12 : f32 to vector<8x128xf32>
    %30 = arith.select %20, %28, %29 : vector<8x128xi1>, vector<8x128xf32>
    %cst_13 = arith.constant dense<0xFF800000> : vector<8xf32>
    %31 = vector.multi_reduction <maximumf>, %30, %cst_13 [1] : vector<8x128xf32> to vector<8xf32>
    %32 = vector.shape_cast %31 : vector<8xf32> to vector<8x1xf32>
    %33 = vector.broadcast %32 : vector<8x1xf32> to vector<8x128xf32>
    %34 = arith.subf %30, %33 : vector<8x128xf32>
    %35 = math.exp %34 : vector<8x128xf32>
    %cst_14 = arith.constant dense<0.000000e+00> : vector<8xf32>
    %36 = vector.multi_reduction <add>, %35, %cst_14 [1] : vector<8x128xf32> to vector<8xf32>
    %37 = vector.shape_cast %36 : vector<8xf32> to vector<8x1xf32>
    %38 = math.log %37 : vector<8x1xf32>
    %cst_15 = arith.constant 0.000000e+00 : f32
    %39 = vector.broadcast %cst_15 : f32 to vector<8x128xf32>
    %40 = arith.select %18, %34, %39 : vector<8x128xi1>, vector<8x128xf32>
    %cst_16 = arith.constant dense<0.000000e+00> : vector<8xf32>
    %41 = vector.multi_reduction <add>, %40, %cst_16 [1] : vector<8x128xf32> to vector<8xf32>
    %42 = vector.shape_cast %41 : vector<8xf32> to vector<8x1xf32>
    %43 = arith.subf %38, %42 : vector<8x1xf32>
    %cst_17 = arith.constant 0.000000e+00 : f32
    %44 = vector.broadcast %cst_17 : f32 to vector<8x1xf32>
    %45 = arith.select %15, %43, %44 : vector<8x1xi1>, vector<8x1xf32>
    %cst_18 = arith.constant dense<0.000000e+00> : vector<1xf32>
    %46 = vector.multi_reduction <add>, %45, %cst_18 [0] : vector<8x1xf32> to vector<1xf32>
    %47 = vector.shape_cast %46 : vector<1xf32> to vector<1x1xf32>
    %48 = arith.addf %21, %47 : vector<1x1xf32>
    %c0_19 = arith.constant 0 : index
    %c0_20 = arith.constant 0 : index
    %49 = vector.load %arg5[%c0_19, %c0_20] : memref<8x48xf32, #tpu.memory_space<vmem>>, vector<8x48xf32>
    %50 = arith.truncf %49 : vector<8x48xf32> to vector<8x48xbf16>
    %c0_21 = arith.constant 0 : index
    %c0_22 = arith.constant 0 : index
    %51 = vector.load %arg6[%c0_21, %c0_22] : memref<48x128xbf16, #tpu.memory_space<vmem>>, vector<48x128xbf16>
    %cst_23 = arith.constant dense<0.000000e+00> : vector<8x128xf32>
    %52 = tpu.matmul %50, %51, %cst_23 {dimension_numbers = #tpu.dot_dimension_numbers<[1], [0], [0], [1], [0, 0, 1, 1], [], []>} : vector<8x48xbf16>, vector<48x128xbf16>, vector<8x128xf32> -> vector<8x128xf32>
    %c0_24 = arith.constant 0 : index
    %c0_25 = arith.constant 0 : index
    %53 = vector.load %arg7[%c0_24, %c0_25] : memref<1x128xf32, #tpu.memory_space<vmem>>, vector<1x128xf32>
    %54 = vector.broadcast %53 : vector<1x128xf32> to vector<8x128xf32>
    %55 = arith.addf %52, %54 : vector<8x128xf32>
    %cst_26 = arith.constant -1.000000e+30 : f32
    %56 = vector.broadcast %cst_26 : f32 to vector<8x128xf32>
    %57 = arith.select %20, %55, %56 : vector<8x128xi1>, vector<8x128xf32>
    %cst_27 = arith.constant dense<0xFF800000> : vector<8xf32>
    %58 = vector.multi_reduction <maximumf>, %57, %cst_27 [1] : vector<8x128xf32> to vector<8xf32>
    %59 = vector.shape_cast %58 : vector<8xf32> to vector<8x1xf32>
    %60 = vector.broadcast %59 : vector<8x1xf32> to vector<8x128xf32>
    %61 = arith.subf %57, %60 : vector<8x128xf32>
    %62 = math.exp %61 : vector<8x128xf32>
    %cst_28 = arith.constant dense<0.000000e+00> : vector<8xf32>
    %63 = vector.multi_reduction <add>, %62, %cst_28 [1] : vector<8x128xf32> to vector<8xf32>
    %64 = vector.shape_cast %63 : vector<8xf32> to vector<8x1xf32>
    %65 = math.log %64 : vector<8x1xf32>
    %cst_29 = arith.constant 0.000000e+00 : f32
    %66 = vector.broadcast %cst_29 : f32 to vector<8x128xf32>
    %67 = arith.select %18, %61, %66 : vector<8x128xi1>, vector<8x128xf32>
    %cst_30 = arith.constant dense<0.000000e+00> : vector<8xf32>
    %68 = vector.multi_reduction <add>, %67, %cst_30 [1] : vector<8x128xf32> to vector<8xf32>
    %69 = vector.shape_cast %68 : vector<8xf32> to vector<8x1xf32>
    %70 = arith.subf %65, %69 : vector<8x1xf32>
    %cst_31 = arith.constant 0.000000e+00 : f32
    %71 = vector.broadcast %cst_31 : f32 to vector<8x1xf32>
    %72 = arith.select %15, %70, %71 : vector<8x1xi1>, vector<8x1xf32>
    %cst_32 = arith.constant dense<0.000000e+00> : vector<1xf32>
    %73 = vector.multi_reduction <add>, %72, %cst_32 [0] : vector<8x1xf32> to vector<1xf32>
    %74 = vector.shape_cast %73 : vector<1xf32> to vector<1x1xf32>
    %75 = arith.addf %48, %74 : vector<1x1xf32>
    %c0_33 = arith.constant 0 : index
    %c0_34 = arith.constant 0 : index
    %76 = vector.load %arg9[%c0_33, %c0_34] : memref<1x1xf32, #tpu.memory_space<vmem>>, vector<1x1xf32>
    %77 = arith.addf %76, %75 : vector<1x1xf32>
    %c0_35 = arith.constant 0 : index
    %c0_36 = arith.constant 0 : index
    %78 = vector.load %arg9[%c0_35, %c0_36] : memref<1x1xf32, #tpu.memory_space<vmem>>, vector<1x1xf32>
    tpu.vector_store %arg9[%c0_35, %c0_36], %77 {strides = array<i32>} : memref<1x1xf32, #tpu.memory_space<vmem>>, vector<1x1xf32>,
    %c0_37 = arith.constant 0 : index
    %c0_38 = arith.constant 0 : index
    %79 = vector.load %arg10[%c0_37, %c0_38] : memref<1x1xf32, #tpu.memory_space<vmem>>, vector<1x1xf32>
    %80 = arith.extui %15 : vector<8x1xi1> to vector<8x1xi32>
    %81 = arith.sitofp %80 : vector<8x1xi32> to vector<8x1xf32>
    %cst_39 = arith.constant dense<0.000000e+00> : vector<1xf32>
    %82 = vector.multi_reduction <add>, %81, %cst_39 [0] : vector<8x1xf32> to vector<1xf32>
    %83 = vector.shape_cast %82 : vector<1xf32> to vector<1x1xf32>
    %84 = arith.addf %79, %83 : vector<1x1xf32>
    %c0_40 = arith.constant 0 : index
    %c0_41 = arith.constant 0 : index
    %85 = vector.load %arg10[%c0_40, %c0_41] : memref<1x1xf32, #tpu.memory_space<vmem>>, vector<1x1xf32>
    tpu.vector_store %arg10[%c0_40, %c0_41], %84 {strides = array<i32>} : memref<1x1xf32, #tpu.memory_space<vmem>>, vector<1x1xf32>,
    %c0_i32_42 = arith.constant 0 : i32
    %86 = arith.cmpi eq, %arg0, %c0_i32_42 : i32
    %87 = arith.extui %86 : i1 to i32
    %c0_i32_43 = arith.constant 0 : i32
    %88 = arith.cmpi ne, %87, %c0_i32_43 : i32
    scf.if %88 {
      %c0_44 = arith.constant 0 : index
      %c0_45 = arith.constant 0 : index
      %89 = vector.load %arg10[%c0_44, %c0_45] : memref<1x1xf32, #tpu.memory_space<vmem>>, vector<1x1xf32>
      %cst_46 = arith.constant 1.000000e+00 : f32
      %90 = vector.broadcast %cst_46 : f32 to vector<1x1xf32>
      %91 = arith.maximumf %89, %90 : vector<1x1xf32>
      %c0_47 = arith.constant 0 : index
      %c0_48 = arith.constant 0 : index
      %92 = vector.load %arg9[%c0_47, %c0_48] : memref<1x1xf32, #tpu.memory_space<vmem>>, vector<1x1xf32>
      %cst_49 = arith.constant 5.000000e-01 : f32
      %93 = vector.broadcast %cst_49 : f32 to vector<1x1xf32>
      %94 = arith.mulf %93, %92 : vector<1x1xf32>
      %95 = arith.divf %94, %91 : vector<1x1xf32>
      %c0_50 = arith.constant 0 : index
      %c0_51 = arith.constant 0 : index
      %96 = vector.load %arg8[%c0_50, %c0_51] : memref<1x1xf32, #tpu.memory_space<vmem>>, vector<1x1xf32>
      tpu.vector_store %arg8[%c0_50, %c0_51], %95 {strides = array<i32>} : memref<1x1xf32, #tpu.memory_space<vmem>>, vector<1x1xf32>,
    } else {
    }
    return
  }
  func.func @transform_0(%arg0: i32) -> (i32, i32) {
    %c0_i32 = arith.constant 0 : i32
    %c0_i32_0 = arith.constant 0 : i32
    return %arg0, %c0_i32 : i32, i32
  }
  func.func @transform_1(%arg0: i32) -> (i32, i32) {
    %c0_i32 = arith.constant 0 : i32
    %c0_i32_0 = arith.constant 0 : i32
    return %arg0, %c0_i32 : i32, i32
  }
  func.func @transform_2(%arg0: i32) -> (i32, i32) {
    %c0_i32 = arith.constant 0 : i32
    %c0_i32_0 = arith.constant 0 : i32
    %c0_i32_1 = arith.constant 0 : i32
    return %c0_i32, %c0_i32_0 : i32, i32
  }
  func.func @transform_3(%arg0: i32) -> (i32, i32) {
    %c0_i32 = arith.constant 0 : i32
    %c0_i32_0 = arith.constant 0 : i32
    %c0_i32_1 = arith.constant 0 : i32
    return %c0_i32, %c0_i32_0 : i32, i32
  }
  func.func @transform_4(%arg0: i32) -> (i32, i32) {
    %c0_i32 = arith.constant 0 : i32
    %c0_i32_0 = arith.constant 0 : i32
    return %arg0, %c0_i32 : i32, i32
  }
  func.func @transform_5(%arg0: i32) -> (i32, i32) {
    %c0_i32 = arith.constant 0 : i32
    %c0_i32_0 = arith.constant 0 : i32
    %c0_i32_1 = arith.constant 0 : i32
    return %c0_i32, %c0_i32_0 : i32, i32
  }
  func.func @transform_6(%arg0: i32) -> (i32, i32) {
    %c0_i32 = arith.constant 0 : i32
    %c0_i32_0 = arith.constant 0 : i32
    %c0_i32_1 = arith.constant 0 : i32
    return %c0_i32, %c0_i32_0 : i32, i32
  }
  func.func @transform_7(%arg0: i32) -> (i32, i32) {
    %c0_i32 = arith.constant 0 : i32
    %c0_i32_0 = arith.constant 0 : i32
    %c0_i32_1 = arith.constant 0 : i32
    return %c0_i32, %c0_i32_0 : i32, i32
  }
}

</mosaic_0001>

<bundles_post_ra>
// kernel: _mobile_neck_loss.1
= control target key start
LH: loop header
LB: loop body
LE: loop exit
PB: predicated region body
PF: predicated region fallthrough
CT: control target
= control target key end

     0   :  { %12 = vsyncpa [#allocation5], 0  ;;  %s575_s0 = inlined_call_operand.vmem [shape: s32[8,1], index: 0, kind: input, shape index: {}]   ;;  %s576_s1 = inlined_call_operand.vmem [shape: f32[8,32], index: 1, kind: input, shape index: {}]   ;;  %s577_s2 = inlined_call_operand.hbm [shape: bf16[32,128], index: 2, kind: input, shape index: {}]   ;;  %s578_s3 = inlined_call_operand.vmem [shape: f32[1,128], index: 3, kind: input, shape index: {}]   ;;  %s579_s4 = inlined_call_operand.hbm [shape: f32[8,48], index: 4, kind: input, shape index: {}]   ;;  %s580_s5 = inlined_call_operand.hbm [shape: bf16[48,128], index: 5, kind: input, shape index: {}]   ;;  %s581_s6 = inlined_call_operand.vmem [shape: f32[1,128], index: 6, kind: input, shape index: {}]   ;;  %s582_s7 = inlined_call_operand.hbm [shape: f32[1,1], index: 7, kind: output, shape index: {}]  }
   0x1   :  { %13 = vsyncpa [#allocation8], 0 }
   0x2   :  { %14 = vsyncpa [#allocation6], 0  ;;  %s474_s24 = smov [#allocation7]   ;;  %s475_s26 = smov [#allocation4]  }
   0x3   :  { %s39_s25 = sshll.u32 %s474_s24, 4  ;;  %s24_s27 = sshll.u32 %s475_s26, 4  ;;  %s40_s25 = int_to_ptr.vmem [resolvable:$true] %s39_s25  ;;  %s25_s27 = int_to_ptr.vmem [resolvable:$true] %s24_s27 }
   0x4   :  { %s396_s28 = scalar_lea.vmem %s40_s25, 128  ;;  %p401_p1 = scmp.lt.s32.totalorder %s40_s25, %s40_s25 }
   0x5   :  { %p397_p0 = scmp.ne.s32.totalorder %s40_s25, %s396_s28  ;;  %p402_p2 = scmp.lt.s32.totalorder %s396_s28, %s396_s28 }
   0x7   :  { %p403_p3 = por %p402_p2, %p401_p1 }
   0x9   :  { %p404_p4 = pnand %p403_p3, %p397_p0 }
   0xb   :  { %407 = shalt.err (!%p404_p4)
}
   0xc   :  { %42 = dma.hbm_to_vmem [thread:$0]  %s579_s4, 128, %s40_s25, [#allocation8]  }
   0xd   :  { %s416_s8 = scalar_lea.vmem %s25_s27, 256  ;;  %p421_p6 = scmp.lt.s32.totalorder %s25_s27, %s25_s27 }
   0xe   :  { %p417_p5 = scmp.ne.s32.totalorder %s25_s27, %s416_s8  ;;  %p422_p7 = scmp.lt.s32.totalorder %s416_s8, %s416_s8 }
  0x10   :  { %p423_p8 = por %p422_p7, %p421_p6 }
  0x12   :  { %p424_p9 = pnand %p423_p8, %p417_p5 }
  0x14   :  { %427 = shalt.err (!%p424_p9)
}
  0x15   :  { %s476_s9 = smov 64   ;;  %s477_s10 = smov 4  }
  0x16   :  { %30 = dma.hbm_to_vmem [thread:$0]  %s577_s2, 256, %s25_s27, [#allocation5], %s476_s9, %s476_s9, %s477_s10  }
  0x17   :  { %s478_s13 = smov [#allocation9]  }
  0x18   :  { %s48_s14 = sshll.u32 %s478_s13, 4  ;;  %s49_s14 = int_to_ptr.vmem [resolvable:$true] %s48_s14 }
  0x19   :  { %s436_s15 = scalar_lea.vmem %s49_s14, 384  ;;  %p441_p11 = scmp.lt.s32.totalorder %s49_s14, %s49_s14 }
  0x1a   :  { %p437_p10 = scmp.ne.s32.totalorder %s49_s14, %s436_s15  ;;  %p442_p12 = scmp.lt.s32.totalorder %s436_s15, %s436_s15 }
  0x1c   :  { %p443_p13 = por %p442_p12, %p441_p11 }
  0x1e   :  { %p444_p0 = pnand %p443_p13, %p437_p10 }
  0x20   :  { %447 = shalt.err (!%p444_p0)
}
  0x21   :  { %54 = dma.hbm_to_vmem [thread:$0]  %s580_s5, 384, %s49_s14, [#allocation8], %s476_s9, %s476_s9, %s477_s10  }
  0x22   :  { %468 = dma.done.wait [#allocation5], 256  }
  0x23   :  { %469 = vsyncadd [#allocation5], 4294967040 }
  0x24   :  { %470 = dma.done.wait [#allocation8], 512  }
  0x25   :  { %471 = vsyncadd [#allocation8], 4294966784  ;;  %v479_v0 = vmov 0.0   ;;  %vm480_vm0 = vmmov 0   ;;  %v373_v1 = vld [vmem:[#allocation4 + $0x8] sm:$0xff]   ;;  %v375_v3 = vld [vmem:[#allocation4] sm:$0xff]   ;;  %v85_v12 = vlaneseq }
  0x26   :  { %344 = vmatprep.subr.bf16.mxu0 %v479_v0  ;;  %352 = vmatprep.subr.bf16.mxu1 %v479_v0  ;;  %v374_v2 = vld [vmem:[#allocation9 + $0x10] sm:$0xff]   ;;  %v376_v4 = vld [vmem:[#allocation9 + $0x8] sm:$0xff]   ;;  %vm117_vm1 = vcmask 261120   ;;  %v377_v7 = vld [vmem:[#allocation9] sm:$0xff]   ;;  %vm218_vm2 = vcmask 392192   ;;  %v481_v11 = vmov 0  }
  0x27   :  { %348 = vmatprep.mubr.msk.bf16.mxu0 %vm480_vm0, %v479_v0  ;;  %358 = vmatprep.mubr.msk.bf16.mxu1 %vm480_vm0, %v479_v0  ;;  %v92_v5 = vld [vmem:[%s576_s1] sm:$0xff]  ;;  %v185_v8 = vld [vmem:[#allocation7] sm:$0xff]  ;;  %v86_v13 = vand.u32 127, %v85_v12  ;;  %vm176_vm8 = vcmask 7168   ;;  %vm71_vm9 = vcmask 0  }
  0x28   :  { %345 = vmatpush3.bf16.msra.mxu0 %v373_v1  ;;  %353 = vmatpush3.bf16.msra.mxu1 %v374_v2  ;;  %v93_v6 = vpack.c.bf16 %v92_v5, %v92_v5  ;;  %v186_v9 = vpack.c.bf16 %v185_v8, %v185_v8  ;;  %v74_v10 = vld [vmem:[%s575_s0] sm:$0xff]  ;;  %72 = vst.msk [vmem:[#allocation2] sm:$0x1] %vm71_vm9, %v479_v0  ;;  %73 = vst.msk [vmem:[#allocation3] sm:$0x1] %vm71_vm9, %v479_v0  ;;  %s482_s0 = smov [#allocation10]  }
  0x29   :  { %346 = vmatprep.subr.bf16.mxu0 %v479_v0  ;;  %354 = vmatprep.subr.bf16.mxu1 %v479_v0  ;;  %v327_v14 = vld [vmem:[%s578_s3] ss:$0 sm:$0xff]  ;;  %vm91_vm3 = vcmp.lt.s32.totalorder %v86_v13, 16  ;;  %vm81_vm5 = vcmp.ge.s32.totalorder %v74_v10, 0  ;;  %vm83_vm6 = vcmp.lt.s32.totalorder %v74_v10, 16  ;;  %s317_s3 = sshll.u32 %s482_s0, 4  ;;  %s318_s3 = int_to_ptr.vmem [resolvable:$true] %s317_s3 }
  0x2a   :  { %371 = vset.pattern.permute.xlu1 %v481_v11  ;;  %372 = vset.pattern.permute.xlu0 %v481_v11  ;;  %v331_v18 = vld [vmem:[%s581_s6] ss:$0 sm:$0xff]  ;;  %vm551_vm7 = vmand %vm81_vm5, %vm83_vm6  ;;  %s448_s6 = scalar_lea.vmem %s318_s3, 16  ;;  %s452_s22 = scalar_lea.vmem %s318_s3, 32 }
  0x2b   :  { %88 = vperm.xlu1 %371, %v74_v10   ;;  %v336_v40 = vsel %vm551_vm7, 1.0, %v479_v0  ;;  %p449_p1 = scmp.ne.s32.totalorder %s318_s3, %s448_s6  ;;  %p453_p2 = scmp.lt.s32.totalorder %s318_s3, %s318_s3 }
  0x2c   :  { %347 = vmatpush3.bf16.msra.mxu0 %v375_v3  ;;  %355 = vmatpush3.bf16.msra.mxu1 %v376_v4  ;;  %v292_v41 = vsel %vm176_vm8, %v336_v40, 0.0  ;;  %p454_p3 = scmp.lt.s32.totalorder %s452_s22, %s448_s6 }
  0x2d   :  { %356 = vmatprep.subr.bf16.mxu1 %v479_v0  ;;  %v293_v42 = vrot.slane %v292_v41, 4 }
  0x2e   :  { %p455_p4 = por %p454_p3, %p453_p2 }
  0x2f   :  { %349 = vmatmul.mubr.msk.bf16.vlgmr.msra.gmra.mxu0 %vm117_vm1, %v93_v6  ;;  %v294_v43 = vadd.f32 %v293_v42, %v292_v41  ;;  %v289_v48 = vld [vmem:[#allocation3] sm:$0x1] }
  0x30   :  { %357 = vmatpush3.bf16.msra.mxu1 %v377_v7  ;;  %p456_p5 = pnand %p455_p4, %p449_p1 }
  0x31   :  { %v295_v44 = vrot.slane %v294_v43, 2 }
  0x33   :  { %359 = vmatmul.mubr.msk.bf16.vlgmr.msra.gmra.mxu1 %vm218_vm2, %v186_v9  ;;  %v296_v45 = vadd.f32 %v295_v44, %v294_v43 }
  0x35   :  { %v297_v46 = vrot.slane %v296_v45, 1 }
  0x37   :  { %v298_v47 = vadd.f32 %v297_v46, %v296_v45 }
  0x39   :  { %v299_v49 = vadd.f32 %v298_v47, %v289_v48 }
  0x3b   :  { %300 = vst.msk [vmem:[#allocation3] sm:$0x1] %vm71_vm9, %v299_v49 }
  0x42   :  { %v304_v6 = vld [vmem:[#allocation3] sm:$0x1] }
  0x43   :  { %v305_v10 = vmax.f32 %v304_v6, 1.0 }
  0xa6   :  { %v89_v35 = vpop.permute.xlu1 %88 }
  0xa7   :  { %vm90_vm4 = vcmp.eq.s32.totalorder %v86_v13, %v89_v35 }
  0xef   :  { %v155_v15 = vpop.f32.mrf.mxu0 }
  0xf0   :  { %v156_v16 = vadd.f32 %v327_v14, %v155_v15  ;;  %v285_v14 = vld [vmem:[#allocation2] sm:$0x1] }
  0xf1   :  { %v350_v17 = vpop.f32.mrf.mxu0 }
  0xf2   :  { %v161_v19 = vsel %vm91_vm3, %v156_v16, -1e+30 }
  0xf3   :  { %162 = vmax.xlane.f32.xlu0 %v161_v19  ;;  %v158_v20 = vpop.f32.mrf.mxu0  ;;  %v256_v21 = vpop.f32.mrf.mxu1 }
  0xf4   :  { %v257_v22 = vadd.f32 %v331_v18, %v256_v21 }
  0xf5   :  { %v351_v23 = vpop.f32.mrf.mxu0  ;;  %v360_v24 = vpop.f32.mrf.mxu1 }
  0xf6   :  { %v262_v25 = vsel %vm91_vm3, %v257_v22, -1e+30 }
  0xf7   :  { %v259_v26 = vpop.f32.mrf.mxu1  ;;  %263 = vmax.xlane.f32.xlu0 %v262_v25 }
  0xf9   :  { %v361_v27 = vpop.f32.mrf.mxu1 }
 0x17c   :  { %v163_v28 = vpop.xlane.xlu0 %162 }
 0x17d   :  { %v164_v29 = vsub.f32 %v161_v19, %v163_v28 }
 0x17f   :  { %v165_v30 = vmul.f32 1.442695, %v164_v29  ;;  %v171_v37 = vsel %vm90_vm4, %v164_v29, 0.0 }
 0x180   :  { %v264_v31 = vpop.xlane.xlu0 %263 }
 0x181   :  { %378 = vpow2.f32 %v165_v30  ;;  %v265_v32 = vsub.f32 %v262_v25, %v264_v31 }
 0x183   :  { %v266_v33 = vmul.f32 1.442695, %v265_v32  ;;  %v272_v38 = vsel %vm90_vm4, %v265_v32, 0.0 }
 0x185   :  { %380 = vpow2.f32 %v266_v33 }
 0x18e   :  { %v379_v34 = vpop.eup %378 }
 0x18f   :  { %167 = vadd.xlane.f32.xlu1 %v379_v34 }
 0x192   :  { %v381_v36 = vpop.eup %380 }
 0x193   :  { %268 = vadd.xlane.f32.xlu0 %v381_v36 }
 0x197   :  { %172 = vadd.xlane.f32.xlu0 %v171_v37 }
 0x19b   :  { %273 = vadd.xlane.f32.xlu0 %v272_v38 }
 0x218   :  { %v168_v50 = vpop.xlane.xlu1 %167 }
 0x219   :  { %382 = vlog2.f32 %v168_v50 }
 0x21c   :  { %v269_v51 = vpop.xlane.xlu0 %268 }
 0x21d   :  { %384 = vlog2.f32 %v269_v51 }
 0x21e   :  { %386 = vrcp.f32 %v305_v10 }
 0x220   :  { %v173_v53 = vpop.xlane.xlu0 %172 }
 0x224   :  { %v274_v61 = vpop.xlane.xlu0 %273 }
 0x226   :  { %v383_v52 = vpop.eup %382 }
 0x227   :  { %v170_v54 = vmul.f32 0.6931472, %v383_v52 }
 0x229   :  { %v174_v55 = vsub.f32 %v170_v54, %v173_v53 }
 0x22a   :  { %v385_v56 = vpop.eup %384 }
 0x22b   :  { %v175_v57 = vsel %vm551_vm7, %v174_v55, 0.0  ;;  %v271_v59 = vmul.f32 0.6931472, %v385_v56  ;;  %v387_v17 = vpop.eup %386 }
 0x22c   :  { %v177_v58 = vsel %vm176_vm8, %v175_v57, 0.0 }
 0x22d   :  { %v178_v60 = vrot.slane %v177_v58, 4  ;;  %v275_v62 = vsub.f32 %v271_v59, %v274_v61 }
 0x22f   :  { %v179_v63 = vadd.f32 %v178_v60, %v177_v58  ;;  %v276_v0 = vsel %vm551_vm7, %v275_v62, 0.0 }
 0x230   :  { %v277_v2 = vsel %vm176_vm8, %v276_v0, 0.0 }
 0x231   :  { %v180_v1 = vrot.slane %v179_v63, 2  ;;  %v278_v3 = vrot.slane %v277_v2, 4 }
 0x233   :  { %v181_v4 = vadd.f32 %v180_v1, %v179_v63  ;;  %v279_v5 = vadd.f32 %v278_v3, %v277_v2 }
 0x235   :  { %v280_v7 = vrot.slane %v279_v5, 2  ;;  %v182_v8 = vrot.slane %v181_v4, 1 }
 0x237   :  { %v281_v9 = vadd.f32 %v280_v7, %v279_v5  ;;  %v183_v12 = vadd.f32 %v182_v8, %v181_v4 }
 0x239   :  { %v282_v11 = vrot.slane %v281_v9, 1 }
 0x23b   :  { %v283_v13 = vadd.f32 %v282_v11, %v281_v9 }
 0x23d   :  { %v284_v15 = vadd.f32 %v283_v13, %v183_v12 }
 0x23f   :  { %v286_v16 = vadd.f32 %v285_v14, %v284_v15 }
 0x241   :  { %288 = vst.msk [vmem:[#allocation2] sm:$0x1] %vm71_vm9, %v286_v16 }
 0x248   :  { %v306_v18 = vld [vmem:[#allocation2] sm:$0x1] }
 0x249   :  { %v307_v19 = vmul.f32 0.5, %v306_v18 }
 0x24b   :  { %v309_v20 = vmul.f32 %v387_v17, %v307_v19 }
 0x24d   :  { %310 = vst.msk [vmem:[#allocation10] sm:$0x1] %vm71_vm9, %v309_v20 }
 0x24e   :  { %459 = shalt.err (!%p456_p5)
}
 0x24f   :  { %320 = dma.vmem_to_hbm [thread:$0]  %s318_s3, 16, %s582_s7, [#allocation6]  }
 0x250   :  { %472 = dma.done.wait [#allocation6], 16  }
 0x251   :  { %473 = vsyncadd [#allocation6], 4294967280 }
 0x252   :  { %324 = vsyncpa [#allocation5], 1 }
 0x253   :  { %325 = vsyncpa [#allocation8], 1 }
 0x254   :  { %326 = vsyncpa [#allocation6], 1 }

</bundles_post_ra>
